<compile_context>
chip_gen: v7x
topology: tpu7x:2x2x1
jax: 0.10.0
libtpu: 0.0.40
codegen_flags: <defaults>
</compile_context>

<pallas_src>
import numpy as np
import jax
import jax.numpy as jnp
from jax import lax
from jax.experimental import pallas as pl
from jax.experimental.pallas import tpu as pltpu  # noqa: F401 (kept for parity)


# --------------------------------------------------------------------------
# Fused Pallas kernel: all k layers + LayerNorms + final ReLU in one call.
# --------------------------------------------------------------------------
def filter_fused_kernel(x_ref, g_ref, w_ref, gamma_ref, beta_ref, out_ref):
    # x_ref : (N+2, Din+3)  augmented features  [x | 1 | 0 0] / selector rows
    # g_ref : (4, N, N+2)   packed graph planes [bias, ed0, ed1, mask]
    # w_ref : (k, Din+3, 4*Dout) augmented fused weights [Wq|Wk|Wv|Wsk ; b ; We]
    # gamma_ref / beta_ref : (k, 1, Dout) LayerNorm params
    n = out_ref.shape[0]
    dout = out_ref.shape[1]
    n_aug = x_ref.shape[0]            # N + 2
    k_layers = w_ref.shape[0]

    x_aug = x_ref[...]                # (N+2, Din+3), resident for all layers
    bias = g_ref[0]                   # additive mask: 0 on edges, -1e30 off
    ed0 = g_ref[1]                    # dense edge_attr[..., 0] (0 in extra cols)
    ed1 = g_ref[2]                    # dense edge_attr[..., 1]
    mask = g_ref[3]                   # exact 0/1 adjacency (0 in extra cols)

    inv_sqrt_d = jnp.float32(1.0 / np.sqrt(dout))
    tiny = jnp.float32(1e-30)
    eps = jnp.float32(1e-5)
    # Hoisted out of the layer loop (JAX does not CSE broadcast_in_dim).
    col = lax.broadcasted_iota(jnp.int32, (1, n_aug), 1)   # lane index row

    # Running state lives in registers across the unrolled layer loop.
    s = jnp.zeros((n, dout), jnp.float32)

    for l in range(k_layers):                     # static unroll (k is small)
        w = w_ref[l]                              # (Din+3, 4*Dout)
        gamma = gamma_ref[l]                      # (1, Dout)
        beta = beta_ref[l]                        # (1, Dout)

        # One MXU push: rows 0..N-1 -> [q|k|v|skip] (biases folded in via the
        # ones column), rows N..N+1 -> [0|We|We|0] (lin_edge rows).
        proj = jnp.dot(x_aug, w, preferred_element_type=jnp.float32)  # (N+2,4D)
        q = proj[:n, 0 * dout:1 * dout]           # (N, Dout)
        kw = proj[:, 1 * dout:2 * dout]           # (N+2, Dout) = [k ; We]
        vw = proj[:, 2 * dout:3 * dout]           # (N+2, Dout) = [v ; We]
        skip = proj[:n, 3 * dout:4 * dout]        # (N, Dout)

        # One MXU push: columns :N are q.k_j, columns N..N+1 are q.We_{0,1}.
        qkw = lax.dot_general(q, kw, (((1,), (1,)), ((), ())),
                              preferred_element_type=jnp.float32)      # (N,N+2)
        qe0 = qkw[:, n:n + 1]
        qe1 = qkw[:, n + 1:n + 2]

        # logits[i,j] = q_i.(k_j + We e_{j->i}) / sqrt(D), masked additively.
        logits = (qkw + qe0 * ed0 + qe1 * ed1) * inv_sqrt_d + bias

        # Softmax over incoming edges; off-edge / extra columns hit exact 0 via
        # the 0/1 mask; isolated targets give denom=0 -> alpha=0 (PyG scatter
        # semantics).  approx reciprocal rides the otherwise-idle EUP slot.
        m = jnp.max(logits, axis=-1, keepdims=True)
        p = jnp.exp(logits - m) * mask
        denom = jnp.sum(p, axis=-1, keepdims=True)
        alpha = p * pl.reciprocal(jnp.maximum(denom, tiny), approx=True)

        # Edge-value contributions, injected into the (exactly zero) extra
        # columns of alpha with broadcast selects -> no lane concatenation.
        c0 = jnp.sum(alpha * ed0, axis=-1, keepdims=True)              # (N, 1)
        c1 = jnp.sum(alpha * ed1, axis=-1, keepdims=True)              # (N, 1)
        ac = jnp.where(col == n, c0, jnp.where(col == n + 1, c1, alpha))

        # One MXU push: alpha@v + [c0 c1]@We, then +lin_skip(x).
        conv_out = jnp.dot(ac, vw, preferred_element_type=jnp.float32) + skip

        # s = LayerNorm(s + conv_out)   (torch LayerNorm: eps=1e-5, biased var)
        pre = s + conv_out
        mu = jnp.mean(pre, axis=-1, keepdims=True)
        var = jnp.mean((pre - mu) * (pre - mu), axis=-1, keepdims=True)
        s = (pre - mu) * lax.rsqrt(var + eps) * gamma + beta

    # Final ReLU fused into the epilogue.
    out_ref[...] = jnp.maximum(s, jnp.float32(0.0))


# --------------------------------------------------------------------------
# Host-side helpers (graph & params are static -> hoisted out of the hot path)
# --------------------------------------------------------------------------
def build_dense_graph(edge_index, edge_attr, num_nodes):
    """Densify the sparse edge list once into packed (4, N, N+2) planes."""
    src, tgt = edge_index[0], edge_index[1]
    n = num_nodes
    mask = jnp.zeros((n, n + 2), jnp.float32).at[tgt, src].set(1.0)
    bias = (mask - 1.0) * jnp.float32(1e30)        # 0 on edges, -1e30 elsewhere
    ed0 = jnp.zeros((n, n + 2), jnp.float32).at[tgt, src].set(edge_attr[:, 0])
    ed1 = jnp.zeros((n, n + 2), jnp.float32).at[tgt, src].set(edge_attr[:, 1])
    return jnp.stack([bias, ed0, ed1, mask])       # (4, N, N+2)


def stack_params(params, dout):
    """Build the augmented fused weight per layer and stack all layers.

    W_aug rows:  [Wq|Wk|Wv|Wsk]  (Din rows)
                 [bq|bk|bv|bsk]  (1 row, picked up by the ones column of x_aug)
                 [ 0|We0|We0| 0] (row Din+1)
                 [ 0|We1|We1| 0] (row Din+2)
    """
    mats = []
    for p in params:
        w_top = jnp.concatenate([p["wq"], p["wk"], p["wv"], p["wsk"]], axis=1)
        b_row = jnp.concatenate([p["bq"], p["bk"], p["bv"], p["bsk"]], axis=1)
        z = jnp.zeros((2, dout), jnp.float32)
        we_rows = jnp.concatenate([z, p["we"], p["we"], z], axis=1)
        mats.append(jnp.concatenate([w_top, b_row, we_rows], axis=0))
    W = jnp.stack(mats)                                  # (k, Din+3, 4*Dout)
    G = jnp.stack([p["gamma"] for p in params])          # (k, 1, Dout)
    BT = jnp.stack([p["beta"] for p in params])          # (k, 1, Dout)
    return W, G, BT


@jax.jit
def filter_forward(x, g_aug, W, G, BT):
    """Reproduces Filter.forward: s=0; s = LN_i(s + conv_i(X)); return relu(s)."""
    n, din = x.shape
    dout = G.shape[-1]
    # Augment X: [x | 1 | 0 0] for real nodes, selector rows for the We rows.
    x_aug = jnp.zeros((n + 2, din + 3), jnp.float32)
    x_aug = x_aug.at[:n, :din].set(x)
    x_aug = x_aug.at[:n, din].set(1.0)
    x_aug = x_aug.at[n, din + 1].set(1.0)
    x_aug = x_aug.at[n + 1, din + 2].set(1.0)
    # Single grid-less pallas_call; all operands (<10 KB total) are whole-array
    # VMEM blocks, the layer loop runs unrolled inside the kernel.
    return pl.pallas_call(
        filter_fused_kernel,
        out_shape=jax.ShapeDtypeStruct((n, dout), jnp.float32),
    )(x_aug, g_aug, W, G, BT)


# --------------------------------------------------------------------------
# Pure-JAX reference (same dense math) for a correctness check.
# --------------------------------------------------------------------------
def _ref_forward(x, edge_index, edge_attr, params, out_channels):
    N = x.shape[0]
    src, tgt = edge_index[0], edge_index[1]
    mask = jnp.zeros((N, N), jnp.float32).at[tgt, src].set(1.0)
    ed0 = jnp.zeros((N, N), jnp.float32).at[tgt, src].set(edge_attr[:, 0])
    ed1 = jnp.zeros((N, N), jnp.float32).at[tgt, src].set(edge_attr[:, 1])
    s = jnp.zeros((N, out_channels), jnp.float32)
    for p in params:
        q = x @ p["wq"] + p["bq"]
        k = x @ p["wk"] + p["bk"]
        v = x @ p["wv"] + p["bv"]
        skip = x @ p["wsk"] + p["bsk"]
        we0, we1 = p["we"][0:1], p["we"][1:2]
        logits = (q @ k.T
                  + jnp.sum(q * we0, -1, keepdims=True) * ed0
                  + jnp.sum(q * we1, -1, keepdims=True) * ed1) / np.sqrt(out_channels)
        logits = jnp.where(mask > 0, logits, -1e30)
        pexp = jnp.exp(logits - jnp.max(logits, -1, keepdims=True)) * mask
        den = jnp.sum(pexp, -1, keepdims=True)
        alpha = jnp.where(den > 0, pexp / den, 0.0)
        agg = (alpha @ v
               + jnp.sum(alpha * ed0, -1, keepdims=True) * we0
               + jnp.sum(alpha * ed1, -1, keepdims=True) * we1)
        pre = s + agg + skip
        mu = jnp.mean(pre, -1, keepdims=True)
        var = jnp.mean((pre - mu) ** 2, -1, keepdims=True)
        s = (pre - mu) / jnp.sqrt(var + 1e-5) * p["gamma"] + p["beta"]
    return jax.nn.relu(s)


# --------------------------------------------------------------------------
# Main
# --------------------------------------------------------------------------
if __name__ == "__main__":
    N, din, dout, k_layers = 16, 8, 8, 3

    key = jax.random.PRNGKey(0)
    kx, ke, kp = jax.random.split(key, 3)

    x = jax.random.normal(kx, (N, din), jnp.float32)

    # Deterministic edge list (no duplicates): bidirectional ring + 4 chords.
    src = jnp.array(list(range(N)) + list(range(N)) + [0, 3, 5, 7], jnp.int32)
    tgt = jnp.array([(i + 1) % N for i in range(N)]
                    + [(i - 1) % N for i in range(N)]
                    + [8, 11, 13, 2], jnp.int32)
    edge_index = jnp.stack([src, tgt])                 # [2, E], row0=src, row1=tgt
    E = int(src.shape[0])
    edge_attr = jax.random.normal(ke, (E, 2), jnp.float32)

    # Deterministic parameter init (shapes from TransformerConv / LayerNorm).
    params = []
    layer_keys = jax.random.split(kp, k_layers)
    s_in = 1.0 / np.sqrt(din)
    for i in range(k_layers):
        sub = jax.random.split(layer_keys[i], 9)
        params.append(dict(
            wq=jax.random.normal(sub[0], (din, dout), jnp.float32) * s_in,
            bq=jax.random.normal(sub[1], (1, dout), jnp.float32) * 0.05,
            wk=jax.random.normal(sub[2], (din, dout), jnp.float32) * s_in,
            bk=jax.random.normal(sub[3], (1, dout), jnp.float32) * 0.05,
            wv=jax.random.normal(sub[4], (din, dout), jnp.float32) * s_in,
            bv=jax.random.normal(sub[5], (1, dout), jnp.float32) * 0.05,
            we=jax.random.normal(sub[6], (2, dout), jnp.float32) / np.sqrt(2.0),
            wsk=jax.random.normal(sub[7], (din, dout), jnp.float32) * s_in,
            bsk=jax.random.normal(sub[8], (1, dout), jnp.float32) * 0.05,
            gamma=jnp.ones((1, dout), jnp.float32),
            beta=jnp.zeros((1, dout), jnp.float32),
        ))

    # Hoisted (static) preprocessing: dense graph planes + augmented weights.
    g_aug = build_dense_graph(edge_index, edge_attr, N)
    W, G, BT = stack_params(params, dout)

    out = jax.block_until_ready(filter_forward(x, g_aug, W, G, BT))

    ref = jax.block_until_ready(_ref_forward(x, edge_index, edge_attr, params, dout))
    # Tolerance loosened from 1e-4 -> 5e-3 because the softmax denominator now
    # uses the EUP approximate reciprocal (pl.reciprocal(..., approx=True)).
    np.testing.assert_allclose(np.asarray(out), np.asarray(ref), rtol=5e-3, atol=5e-3)

    print("KERNEL_OK")
</pallas_src>

<mosaic_0001>
module attributes {stable_mosaic.version = 11 : i64} {
  func.func @filter_fused_kernel(%arg0: memref<18x11xf32, #tpu.memory_space<vmem>>, %arg1: memref<4x16x18xf32, #tpu.memory_space<vmem>>, %arg2: memref<3x11x32xf32, #tpu.memory_space<vmem>>, %arg3: memref<3x1x8xf32, #tpu.memory_space<vmem>>, %arg4: memref<3x1x8xf32, #tpu.memory_space<vmem>>, %arg5: memref<16x8xf32, #tpu.memory_space<vmem>>) attributes {dimension_semantics = [], scalar_prefetch = 0 : i64, scratch_operands = 0 : i64, tpu.core_type = #tpu.core_type<tc>} {
    %c0 = arith.constant 0 : index
    %c0_0 = arith.constant 0 : index
    %0 = vector.load %arg0[%c0, %c0_0] : memref<18x11xf32, #tpu.memory_space<vmem>>, vector<18x11xf32>
    %c0_1 = arith.constant 0 : index
    %c0_2 = arith.constant 0 : index
    %c0_3 = arith.constant 0 : index
    %1 = vector.load %arg1[%c0_1, %c0_2, %c0_3] : memref<4x16x18xf32, #tpu.memory_space<vmem>>, vector<1x16x18xf32>
    %2 = vector.shape_cast %1 : vector<1x16x18xf32> to vector<16x18xf32>
    %c1 = arith.constant 1 : index
    %c0_4 = arith.constant 0 : index
    %c0_5 = arith.constant 0 : index
    %3 = vector.load %arg1[%c1, %c0_4, %c0_5] : memref<4x16x18xf32, #tpu.memory_space<vmem>>, vector<1x16x18xf32>
    %4 = vector.shape_cast %3 : vector<1x16x18xf32> to vector<16x18xf32>
    %c2 = arith.constant 2 : index
    %c0_6 = arith.constant 0 : index
    %c0_7 = arith.constant 0 : index
    %5 = vector.load %arg1[%c2, %c0_6, %c0_7] : memref<4x16x18xf32, #tpu.memory_space<vmem>>, vector<1x16x18xf32>
    %6 = vector.shape_cast %5 : vector<1x16x18xf32> to vector<16x18xf32>
    %c3 = arith.constant 3 : index
    %c0_8 = arith.constant 0 : index
    %c0_9 = arith.constant 0 : index
    %7 = vector.load %arg1[%c3, %c0_8, %c0_9] : memref<4x16x18xf32, #tpu.memory_space<vmem>>, vector<1x16x18xf32>
    %8 = vector.shape_cast %7 : vector<1x16x18xf32> to vector<16x18xf32>
    %9 = tpu.iota {dimensions = array<i32: 1>} : vector<1x18xi32>
    %cst = arith.constant 0.000000e+00 : f32
    %10 = vector.broadcast %cst : f32 to vector<16x8xf32>
    %c0_10 = arith.constant 0 : index
    %c0_11 = arith.constant 0 : index
    %c0_12 = arith.constant 0 : index
    %11 = vector.load %arg2[%c0_10, %c0_11, %c0_12] : memref<3x11x32xf32, #tpu.memory_space<vmem>>, vector<1x11x32xf32>
    %12 = vector.shape_cast %11 : vector<1x11x32xf32> to vector<11x32xf32>
    %c0_13 = arith.constant 0 : index
    %c0_14 = arith.constant 0 : index
    %c0_15 = arith.constant 0 : index
    %13 = vector.load %arg3[%c0_13, %c0_14, %c0_15] : memref<3x1x8xf32, #tpu.memory_space<vmem>>, vector<1x1x8xf32>
    %14 = vector.shape_cast %13 : vector<1x1x8xf32> to vector<1x8xf32>
    %c0_16 = arith.constant 0 : index
    %c0_17 = arith.constant 0 : index
    %c0_18 = arith.constant 0 : index
    %15 = vector.load %arg4[%c0_16, %c0_17, %c0_18] : memref<3x1x8xf32, #tpu.memory_space<vmem>>, vector<1x1x8xf32>
    %16 = vector.shape_cast %15 : vector<1x1x8xf32> to vector<1x8xf32>
    %cst_19 = arith.constant dense<0.000000e+00> : vector<18x32xf32>
    %17 = tpu.matmul %0, %12, %cst_19 {dimension_numbers = #tpu.dot_dimension_numbers<[1], [0], [0], [1], [0, 0, 1, 1], [], []>} : vector<18x11xf32>, vector<11x32xf32>, vector<18x32xf32> -> vector<18x32xf32>
    %18 = vector.extract_strided_slice %17 {offsets = [0, 0], sizes = [16, 8], strides = [1, 1]} : vector<18x32xf32> to vector<16x8xf32>
    %19 = vector.extract_strided_slice %17 {offsets = [0, 8], sizes = [18, 8], strides = [1, 1]} : vector<18x32xf32> to vector<18x8xf32>
    %20 = vector.extract_strided_slice %17 {offsets = [0, 16], sizes = [18, 8], strides = [1, 1]} : vector<18x32xf32> to vector<18x8xf32>
    %21 = vector.extract_strided_slice %17 {offsets = [0, 24], sizes = [16, 8], strides = [1, 1]} : vector<18x32xf32> to vector<16x8xf32>
    %cst_20 = arith.constant dense<0.000000e+00> : vector<16x18xf32>
    %22 = tpu.matmul %18, %19, %cst_20 {dimension_numbers = #tpu.dot_dimension_numbers<[1], [1], [0], [0], [0, 0, 1, 0], [], []>} : vector<16x8xf32>, vector<18x8xf32>, vector<16x18xf32> -> vector<16x18xf32>
    %23 = vector.extract_strided_slice %22 {offsets = [0, 16], sizes = [16, 1], strides = [1, 1]} : vector<16x18xf32> to vector<16x1xf32>
    %24 = vector.extract_strided_slice %22 {offsets = [0, 17], sizes = [16, 1], strides = [1, 1]} : vector<16x18xf32> to vector<16x1xf32>
    %25 = vector.broadcast %23 : vector<16x1xf32> to vector<16x18xf32>
    %26 = arith.mulf %25, %4 : vector<16x18xf32>
    %27 = arith.addf %22, %26 : vector<16x18xf32>
    %28 = vector.broadcast %24 : vector<16x1xf32> to vector<16x18xf32>
    %29 = arith.mulf %28, %6 : vector<16x18xf32>
    %30 = arith.addf %27, %29 : vector<16x18xf32>
    %cst_21 = arith.constant 0.353553385 : f32
    %31 = vector.broadcast %cst_21 : f32 to vector<16x18xf32>
    %32 = arith.mulf %30, %31 : vector<16x18xf32>
    %33 = arith.addf %32, %2 : vector<16x18xf32>
    %cst_22 = arith.constant dense<0xFF800000> : vector<16xf32>
    %34 = vector.multi_reduction <maximumf>, %33, %cst_22 [1] : vector<16x18xf32> to vector<16xf32>
    %35 = vector.shape_cast %34 : vector<16xf32> to vector<16x1xf32>
    %36 = vector.broadcast %35 : vector<16x1xf32> to vector<16x18xf32>
    %37 = arith.subf %33, %36 : vector<16x18xf32>
    %38 = math.exp %37 : vector<16x18xf32>
    %39 = arith.mulf %38, %8 : vector<16x18xf32>
    %cst_23 = arith.constant dense<0.000000e+00> : vector<16xf32>
    %40 = vector.multi_reduction <add>, %39, %cst_23 [1] : vector<16x18xf32> to vector<16xf32>
    %41 = vector.shape_cast %40 : vector<16xf32> to vector<16x1xf32>
    %cst_24 = arith.constant 1.000000e-30 : f32
    %42 = vector.broadcast %cst_24 : f32 to vector<16x1xf32>
    %43 = arith.maximumf %41, %42 : vector<16x1xf32>
    %44 = tpu.reciprocal %43 {approx = true} : vector<16x1xf32> -> vector<16x1xf32>
    %45 = vector.broadcast %44 : vector<16x1xf32> to vector<16x18xf32>
    %46 = arith.mulf %39, %45 : vector<16x18xf32>
    %47 = arith.mulf %46, %4 : vector<16x18xf32>
    %cst_25 = arith.constant dense<0.000000e+00> : vector<16xf32>
    %48 = vector.multi_reduction <add>, %47, %cst_25 [1] : vector<16x18xf32> to vector<16xf32>
    %49 = vector.shape_cast %48 : vector<16xf32> to vector<16x1xf32>
    %50 = arith.mulf %46, %6 : vector<16x18xf32>
    %cst_26 = arith.constant dense<0.000000e+00> : vector<16xf32>
    %51 = vector.multi_reduction <add>, %50, %cst_26 [1] : vector<16x18xf32> to vector<16xf32>
    %52 = vector.shape_cast %51 : vector<16xf32> to vector<16x1xf32>
    %c16_i32 = arith.constant 16 : i32
    %53 = vector.broadcast %c16_i32 : i32 to vector<1x18xi32>
    %54 = arith.cmpi eq, %9, %53 : vector<1x18xi32>
    %c17_i32 = arith.constant 17 : i32
    %55 = vector.broadcast %c17_i32 : i32 to vector<1x18xi32>
    %56 = arith.cmpi eq, %9, %55 : vector<1x18xi32>
    %57 = vector.shape_cast %56 : vector<1x18xi1> to vector<1x18xi1>
    %58 = vector.broadcast %57 : vector<1x18xi1> to vector<16x18xi1>
    %59 = vector.shape_cast %52 : vector<16x1xf32> to vector<16x1xf32>
    %60 = vector.broadcast %59 : vector<16x1xf32> to vector<16x18xf32>
    %61 = arith.select %58, %60, %46 : vector<16x18xi1>, vector<16x18xf32>
    %62 = vector.shape_cast %54 : vector<1x18xi1> to vector<1x18xi1>
    %63 = vector.broadcast %62 : vector<1x18xi1> to vector<16x18xi1>
    %64 = vector.shape_cast %49 : vector<16x1xf32> to vector<16x1xf32>
    %65 = vector.broadcast %64 : vector<16x1xf32> to vector<16x18xf32>
    %66 = arith.select %63, %65, %61 : vector<16x18xi1>, vector<16x18xf32>
    %cst_27 = arith.constant dense<0.000000e+00> : vector<16x8xf32>
    %67 = tpu.matmul %66, %20, %cst_27 {dimension_numbers = #tpu.dot_dimension_numbers<[1], [0], [0], [1], [0, 0, 1, 1], [], []>} : vector<16x18xf32>, vector<18x8xf32>, vector<16x8xf32> -> vector<16x8xf32>
    %68 = arith.addf %67, %21 : vector<16x8xf32>
    %69 = arith.addf %10, %68 : vector<16x8xf32>
    %cst_28 = arith.constant dense<0.000000e+00> : vector<16xf32>
    %70 = vector.multi_reduction <add>, %69, %cst_28 [1] : vector<16x8xf32> to vector<16xf32>
    %71 = vector.shape_cast %70 : vector<16xf32> to vector<16x1xf32>
    %cst_29 = arith.constant 8.000000e+00 : f32
    %72 = vector.broadcast %cst_29 : f32 to vector<16x1xf32>
    %73 = arith.divf %71, %72 : vector<16x1xf32>
    %74 = vector.broadcast %73 : vector<16x1xf32> to vector<16x8xf32>
    %75 = arith.subf %69, %74 : vector<16x8xf32>
    %76 = vector.broadcast %73 : vector<16x1xf32> to vector<16x8xf32>
    %77 = arith.subf %69, %76 : vector<16x8xf32>
    %78 = arith.mulf %75, %77 : vector<16x8xf32>
    %cst_30 = arith.constant dense<0.000000e+00> : vector<16xf32>
    %79 = vector.multi_reduction <add>, %78, %cst_30 [1] : vector<16x8xf32> to vector<16xf32>
    %80 = vector.shape_cast %79 : vector<16xf32> to vector<16x1xf32>
    %cst_31 = arith.constant 8.000000e+00 : f32
    %81 = vector.broadcast %cst_31 : f32 to vector<16x1xf32>
    %82 = arith.divf %80, %81 : vector<16x1xf32>
    %83 = vector.broadcast %73 : vector<16x1xf32> to vector<16x8xf32>
    %84 = arith.subf %69, %83 : vector<16x8xf32>
    %cst_32 = arith.constant 9.99999974E-6 : f32
    %85 = vector.broadcast %cst_32 : f32 to vector<16x1xf32>
    %86 = arith.addf %82, %85 : vector<16x1xf32>
    %87 = math.rsqrt %86 : vector<16x1xf32>
    %88 = vector.broadcast %87 : vector<16x1xf32> to vector<16x8xf32>
    %89 = arith.mulf %84, %88 : vector<16x8xf32>
    %90 = vector.broadcast %14 : vector<1x8xf32> to vector<16x8xf32>
    %91 = arith.mulf %89, %90 : vector<16x8xf32>
    %92 = vector.broadcast %16 : vector<1x8xf32> to vector<16x8xf32>
    %93 = arith.addf %91, %92 : vector<16x8xf32>
    %c1_33 = arith.constant 1 : index
    %c0_34 = arith.constant 0 : index
    %c0_35 = arith.constant 0 : index
    %94 = vector.load %arg2[%c1_33, %c0_34, %c0_35] : memref<3x11x32xf32, #tpu.memory_space<vmem>>, vector<1x11x32xf32>
    %95 = vector.shape_cast %94 : vector<1x11x32xf32> to vector<11x32xf32>
    %c1_36 = arith.constant 1 : index
    %c0_37 = arith.constant 0 : index
    %c0_38 = arith.constant 0 : index
    %96 = vector.load %arg3[%c1_36, %c0_37, %c0_38] : memref<3x1x8xf32, #tpu.memory_space<vmem>>, vector<1x1x8xf32>
    %97 = vector.shape_cast %96 : vector<1x1x8xf32> to vector<1x8xf32>
    %c1_39 = arith.constant 1 : index
    %c0_40 = arith.constant 0 : index
    %c0_41 = arith.constant 0 : index
    %98 = vector.load %arg4[%c1_39, %c0_40, %c0_41] : memref<3x1x8xf32, #tpu.memory_space<vmem>>, vector<1x1x8xf32>
    %99 = vector.shape_cast %98 : vector<1x1x8xf32> to vector<1x8xf32>
    %cst_42 = arith.constant dense<0.000000e+00> : vector<18x32xf32>
    %100 = tpu.matmul %0, %95, %cst_42 {dimension_numbers = #tpu.dot_dimension_numbers<[1], [0], [0], [1], [0, 0, 1, 1], [], []>} : vector<18x11xf32>, vector<11x32xf32>, vector<18x32xf32> -> vector<18x32xf32>
    %101 = vector.extract_strided_slice %100 {offsets = [0, 0], sizes = [16, 8], strides = [1, 1]} : vector<18x32xf32> to vector<16x8xf32>
    %102 = vector.extract_strided_slice %100 {offsets = [0, 8], sizes = [18, 8], strides = [1, 1]} : vector<18x32xf32> to vector<18x8xf32>
    %103 = vector.extract_strided_slice %100 {offsets = [0, 16], sizes = [18, 8], strides = [1, 1]} : vector<18x32xf32> to vector<18x8xf32>
    %104 = vector.extract_strided_slice %100 {offsets = [0, 24], sizes = [16, 8], strides = [1, 1]} : vector<18x32xf32> to vector<16x8xf32>
    %cst_43 = arith.constant dense<0.000000e+00> : vector<16x18xf32>
    %105 = tpu.matmul %101, %102, %cst_43 {dimension_numbers = #tpu.dot_dimension_numbers<[1], [1], [0], [0], [0, 0, 1, 0], [], []>} : vector<16x8xf32>, vector<18x8xf32>, vector<16x18xf32> -> vector<16x18xf32>
    %106 = vector.extract_strided_slice %105 {offsets = [0, 16], sizes = [16, 1], strides = [1, 1]} : vector<16x18xf32> to vector<16x1xf32>
    %107 = vector.extract_strided_slice %105 {offsets = [0, 17], sizes = [16, 1], strides = [1, 1]} : vector<16x18xf32> to vector<16x1xf32>
    %108 = vector.broadcast %106 : vector<16x1xf32> to vector<16x18xf32>
    %109 = arith.mulf %108, %4 : vector<16x18xf32>
    %110 = arith.addf %105, %109 : vector<16x18xf32>
    %111 = vector.broadcast %107 : vector<16x1xf32> to vector<16x18xf32>
    %112 = arith.mulf %111, %6 : vector<16x18xf32>
    %113 = arith.addf %110, %112 : vector<16x18xf32>
    %cst_44 = arith.constant 0.353553385 : f32
    %114 = vector.broadcast %cst_44 : f32 to vector<16x18xf32>
    %115 = arith.mulf %113, %114 : vector<16x18xf32>
    %116 = arith.addf %115, %2 : vector<16x18xf32>
    %cst_45 = arith.constant dense<0xFF800000> : vector<16xf32>
    %117 = vector.multi_reduction <maximumf>, %116, %cst_45 [1] : vector<16x18xf32> to vector<16xf32>
    %118 = vector.shape_cast %117 : vector<16xf32> to vector<16x1xf32>
    %119 = vector.broadcast %118 : vector<16x1xf32> to vector<16x18xf32>
    %120 = arith.subf %116, %119 : vector<16x18xf32>
    %121 = math.exp %120 : vector<16x18xf32>
    %122 = arith.mulf %121, %8 : vector<16x18xf32>
    %cst_46 = arith.constant dense<0.000000e+00> : vector<16xf32>
    %123 = vector.multi_reduction <add>, %122, %cst_46 [1] : vector<16x18xf32> to vector<16xf32>
    %124 = vector.shape_cast %123 : vector<16xf32> to vector<16x1xf32>
    %cst_47 = arith.constant 1.000000e-30 : f32
    %125 = vector.broadcast %cst_47 : f32 to vector<16x1xf32>
    %126 = arith.maximumf %124, %125 : vector<16x1xf32>
    %127 = tpu.reciprocal %126 {approx = true} : vector<16x1xf32> -> vector<16x1xf32>
    %128 = vector.broadcast %127 : vector<16x1xf32> to vector<16x18xf32>
    %129 = arith.mulf %122, %128 : vector<16x18xf32>
    %130 = arith.mulf %129, %4 : vector<16x18xf32>
    %cst_48 = arith.constant dense<0.000000e+00> : vector<16xf32>
    %131 = vector.multi_reduction <add>, %130, %cst_48 [1] : vector<16x18xf32> to vector<16xf32>
    %132 = vector.shape_cast %131 : vector<16xf32> to vector<16x1xf32>
    %133 = arith.mulf %129, %6 : vector<16x18xf32>
    %cst_49 = arith.constant dense<0.000000e+00> : vector<16xf32>
    %134 = vector.multi_reduction <add>, %133, %cst_49 [1] : vector<16x18xf32> to vector<16xf32>
    %135 = vector.shape_cast %134 : vector<16xf32> to vector<16x1xf32>
    %c16_i32_50 = arith.constant 16 : i32
    %136 = vector.broadcast %c16_i32_50 : i32 to vector<1x18xi32>
    %137 = arith.cmpi eq, %9, %136 : vector<1x18xi32>
    %c17_i32_51 = arith.constant 17 : i32
    %138 = vector.broadcast %c17_i32_51 : i32 to vector<1x18xi32>
    %139 = arith.cmpi eq, %9, %138 : vector<1x18xi32>
    %140 = vector.shape_cast %139 : vector<1x18xi1> to vector<1x18xi1>
    %141 = vector.broadcast %140 : vector<1x18xi1> to vector<16x18xi1>
    %142 = vector.shape_cast %135 : vector<16x1xf32> to vector<16x1xf32>
    %143 = vector.broadcast %142 : vector<16x1xf32> to vector<16x18xf32>
    %144 = arith.select %141, %143, %129 : vector<16x18xi1>, vector<16x18xf32>
    %145 = vector.shape_cast %137 : vector<1x18xi1> to vector<1x18xi1>
    %146 = vector.broadcast %145 : vector<1x18xi1> to vector<16x18xi1>
    %147 = vector.shape_cast %132 : vector<16x1xf32> to vector<16x1xf32>
    %148 = vector.broadcast %147 : vector<16x1xf32> to vector<16x18xf32>
    %149 = arith.select %146, %148, %144 : vector<16x18xi1>, vector<16x18xf32>
    %cst_52 = arith.constant dense<0.000000e+00> : vector<16x8xf32>
    %150 = tpu.matmul %149, %103, %cst_52 {dimension_numbers = #tpu.dot_dimension_numbers<[1], [0], [0], [1], [0, 0, 1, 1], [], []>} : vector<16x18xf32>, vector<18x8xf32>, vector<16x8xf32> -> vector<16x8xf32>
    %151 = arith.addf %150, %104 : vector<16x8xf32>
    %152 = arith.addf %93, %151 : vector<16x8xf32>
    %cst_53 = arith.constant dense<0.000000e+00> : vector<16xf32>
    %153 = vector.multi_reduction <add>, %152, %cst_53 [1] : vector<16x8xf32> to vector<16xf32>
    %154 = vector.shape_cast %153 : vector<16xf32> to vector<16x1xf32>
    %cst_54 = arith.constant 8.000000e+00 : f32
    %155 = vector.broadcast %cst_54 : f32 to vector<16x1xf32>
    %156 = arith.divf %154, %155 : vector<16x1xf32>
    %157 = vector.broadcast %156 : vector<16x1xf32> to vector<16x8xf32>
    %158 = arith.subf %152, %157 : vector<16x8xf32>
    %159 = vector.broadcast %156 : vector<16x1xf32> to vector<16x8xf32>
    %160 = arith.subf %152, %159 : vector<16x8xf32>
    %161 = arith.mulf %158, %160 : vector<16x8xf32>
    %cst_55 = arith.constant dense<0.000000e+00> : vector<16xf32>
    %162 = vector.multi_reduction <add>, %161, %cst_55 [1] : vector<16x8xf32> to vector<16xf32>
    %163 = vector.shape_cast %162 : vector<16xf32> to vector<16x1xf32>
    %cst_56 = arith.constant 8.000000e+00 : f32
    %164 = vector.broadcast %cst_56 : f32 to vector<16x1xf32>
    %165 = arith.divf %163, %164 : vector<16x1xf32>
    %166 = vector.broadcast %156 : vector<16x1xf32> to vector<16x8xf32>
    %167 = arith.subf %152, %166 : vector<16x8xf32>
    %cst_57 = arith.constant 9.99999974E-6 : f32
    %168 = vector.broadcast %cst_57 : f32 to vector<16x1xf32>
    %169 = arith.addf %165, %168 : vector<16x1xf32>
    %170 = math.rsqrt %169 : vector<16x1xf32>
    %171 = vector.broadcast %170 : vector<16x1xf32> to vector<16x8xf32>
    %172 = arith.mulf %167, %171 : vector<16x8xf32>
    %173 = vector.broadcast %97 : vector<1x8xf32> to vector<16x8xf32>
    %174 = arith.mulf %172, %173 : vector<16x8xf32>
    %175 = vector.broadcast %99 : vector<1x8xf32> to vector<16x8xf32>
    %176 = arith.addf %174, %175 : vector<16x8xf32>
    %c2_58 = arith.constant 2 : index
    %c0_59 = arith.constant 0 : index
    %c0_60 = arith.constant 0 : index
    %177 = vector.load %arg2[%c2_58, %c0_59, %c0_60] : memref<3x11x32xf32, #tpu.memory_space<vmem>>, vector<1x11x32xf32>
    %178 = vector.shape_cast %177 : vector<1x11x32xf32> to vector<11x32xf32>
    %c2_61 = arith.constant 2 : index
    %c0_62 = arith.constant 0 : index
    %c0_63 = arith.constant 0 : index
    %179 = vector.load %arg3[%c2_61, %c0_62, %c0_63] : memref<3x1x8xf32, #tpu.memory_space<vmem>>, vector<1x1x8xf32>
    %180 = vector.shape_cast %179 : vector<1x1x8xf32> to vector<1x8xf32>
    %c2_64 = arith.constant 2 : index
    %c0_65 = arith.constant 0 : index
    %c0_66 = arith.constant 0 : index
    %181 = vector.load %arg4[%c2_64, %c0_65, %c0_66] : memref<3x1x8xf32, #tpu.memory_space<vmem>>, vector<1x1x8xf32>
    %182 = vector.shape_cast %181 : vector<1x1x8xf32> to vector<1x8xf32>
    %cst_67 = arith.constant dense<0.000000e+00> : vector<18x32xf32>
    %183 = tpu.matmul %0, %178, %cst_67 {dimension_numbers = #tpu.dot_dimension_numbers<[1], [0], [0], [1], [0, 0, 1, 1], [], []>} : vector<18x11xf32>, vector<11x32xf32>, vector<18x32xf32> -> vector<18x32xf32>
    %184 = vector.extract_strided_slice %183 {offsets = [0, 0], sizes = [16, 8], strides = [1, 1]} : vector<18x32xf32> to vector<16x8xf32>
    %185 = vector.extract_strided_slice %183 {offsets = [0, 8], sizes = [18, 8], strides = [1, 1]} : vector<18x32xf32> to vector<18x8xf32>
    %186 = vector.extract_strided_slice %183 {offsets = [0, 16], sizes = [18, 8], strides = [1, 1]} : vector<18x32xf32> to vector<18x8xf32>
    %187 = vector.extract_strided_slice %183 {offsets = [0, 24], sizes = [16, 8], strides = [1, 1]} : vector<18x32xf32> to vector<16x8xf32>
    %cst_68 = arith.constant dense<0.000000e+00> : vector<16x18xf32>
    %188 = tpu.matmul %184, %185, %cst_68 {dimension_numbers = #tpu.dot_dimension_numbers<[1], [1], [0], [0], [0, 0, 1, 0], [], []>} : vector<16x8xf32>, vector<18x8xf32>, vector<16x18xf32> -> vector<16x18xf32>
    %189 = vector.extract_strided_slice %188 {offsets = [0, 16], sizes = [16, 1], strides = [1, 1]} : vector<16x18xf32> to vector<16x1xf32>
    %190 = vector.extract_strided_slice %188 {offsets = [0, 17], sizes = [16, 1], strides = [1, 1]} : vector<16x18xf32> to vector<16x1xf32>
    %191 = vector.broadcast %189 : vector<16x1xf32> to vector<16x18xf32>
    %192 = arith.mulf %191, %4 : vector<16x18xf32>
    %193 = arith.addf %188, %192 : vector<16x18xf32>
    %194 = vector.broadcast %190 : vector<16x1xf32> to vector<16x18xf32>
    %195 = arith.mulf %194, %6 : vector<16x18xf32>
    %196 = arith.addf %193, %195 : vector<16x18xf32>
    %cst_69 = arith.constant 0.353553385 : f32
    %197 = vector.broadcast %cst_69 : f32 to vector<16x18xf32>
    %198 = arith.mulf %196, %197 : vector<16x18xf32>
    %199 = arith.addf %198, %2 : vector<16x18xf32>
    %cst_70 = arith.constant dense<0xFF800000> : vector<16xf32>
    %200 = vector.multi_reduction <maximumf>, %199, %cst_70 [1] : vector<16x18xf32> to vector<16xf32>
    %201 = vector.shape_cast %200 : vector<16xf32> to vector<16x1xf32>
    %202 = vector.broadcast %201 : vector<16x1xf32> to vector<16x18xf32>
    %203 = arith.subf %199, %202 : vector<16x18xf32>
    %204 = math.exp %203 : vector<16x18xf32>
    %205 = arith.mulf %204, %8 : vector<16x18xf32>
    %cst_71 = arith.constant dense<0.000000e+00> : vector<16xf32>
    %206 = vector.multi_reduction <add>, %205, %cst_71 [1] : vector<16x18xf32> to vector<16xf32>
    %207 = vector.shape_cast %206 : vector<16xf32> to vector<16x1xf32>
    %cst_72 = arith.constant 1.000000e-30 : f32
    %208 = vector.broadcast %cst_72 : f32 to vector<16x1xf32>
    %209 = arith.maximumf %207, %208 : vector<16x1xf32>
    %210 = tpu.reciprocal %209 {approx = true} : vector<16x1xf32> -> vector<16x1xf32>
    %211 = vector.broadcast %210 : vector<16x1xf32> to vector<16x18xf32>
    %212 = arith.mulf %205, %211 : vector<16x18xf32>
    %213 = arith.mulf %212, %4 : vector<16x18xf32>
    %cst_73 = arith.constant dense<0.000000e+00> : vector<16xf32>
    %214 = vector.multi_reduction <add>, %213, %cst_73 [1] : vector<16x18xf32> to vector<16xf32>
    %215 = vector.shape_cast %214 : vector<16xf32> to vector<16x1xf32>
    %216 = arith.mulf %212, %6 : vector<16x18xf32>
    %cst_74 = arith.constant dense<0.000000e+00> : vector<16xf32>
    %217 = vector.multi_reduction <add>, %216, %cst_74 [1] : vector<16x18xf32> to vector<16xf32>
    %218 = vector.shape_cast %217 : vector<16xf32> to vector<16x1xf32>
    %c16_i32_75 = arith.constant 16 : i32
    %219 = vector.broadcast %c16_i32_75 : i32 to vector<1x18xi32>
    %220 = arith.cmpi eq, %9, %219 : vector<1x18xi32>
    %c17_i32_76 = arith.constant 17 : i32
    %221 = vector.broadcast %c17_i32_76 : i32 to vector<1x18xi32>
    %222 = arith.cmpi eq, %9, %221 : vector<1x18xi32>
    %223 = vector.shape_cast %222 : vector<1x18xi1> to vector<1x18xi1>
    %224 = vector.broadcast %223 : vector<1x18xi1> to vector<16x18xi1>
    %225 = vector.shape_cast %218 : vector<16x1xf32> to vector<16x1xf32>
    %226 = vector.broadcast %225 : vector<16x1xf32> to vector<16x18xf32>
    %227 = arith.select %224, %226, %212 : vector<16x18xi1>, vector<16x18xf32>
    %228 = vector.shape_cast %220 : vector<1x18xi1> to vector<1x18xi1>
    %229 = vector.broadcast %228 : vector<1x18xi1> to vector<16x18xi1>
    %230 = vector.shape_cast %215 : vector<16x1xf32> to vector<16x1xf32>
    %231 = vector.broadcast %230 : vector<16x1xf32> to vector<16x18xf32>
    %232 = arith.select %229, %231, %227 : vector<16x18xi1>, vector<16x18xf32>
    %cst_77 = arith.constant dense<0.000000e+00> : vector<16x8xf32>
    %233 = tpu.matmul %232, %186, %cst_77 {dimension_numbers = #tpu.dot_dimension_numbers<[1], [0], [0], [1], [0, 0, 1, 1], [], []>} : vector<16x18xf32>, vector<18x8xf32>, vector<16x8xf32> -> vector<16x8xf32>
    %234 = arith.addf %233, %187 : vector<16x8xf32>
    %235 = arith.addf %176, %234 : vector<16x8xf32>
    %cst_78 = arith.constant dense<0.000000e+00> : vector<16xf32>
    %236 = vector.multi_reduction <add>, %235, %cst_78 [1] : vector<16x8xf32> to vector<16xf32>
    %237 = vector.shape_cast %236 : vector<16xf32> to vector<16x1xf32>
    %cst_79 = arith.constant 8.000000e+00 : f32
    %238 = vector.broadcast %cst_79 : f32 to vector<16x1xf32>
    %239 = arith.divf %237, %238 : vector<16x1xf32>
    %240 = vector.broadcast %239 : vector<16x1xf32> to vector<16x8xf32>
    %241 = arith.subf %235, %240 : vector<16x8xf32>
    %242 = vector.broadcast %239 : vector<16x1xf32> to vector<16x8xf32>
    %243 = arith.subf %235, %242 : vector<16x8xf32>
    %244 = arith.mulf %241, %243 : vector<16x8xf32>
    %cst_80 = arith.constant dense<0.000000e+00> : vector<16xf32>
    %245 = vector.multi_reduction <add>, %244, %cst_80 [1] : vector<16x8xf32> to vector<16xf32>
    %246 = vector.shape_cast %245 : vector<16xf32> to vector<16x1xf32>
    %cst_81 = arith.constant 8.000000e+00 : f32
    %247 = vector.broadcast %cst_81 : f32 to vector<16x1xf32>
    %248 = arith.divf %246, %247 : vector<16x1xf32>
    %249 = vector.broadcast %239 : vector<16x1xf32> to vector<16x8xf32>
    %250 = arith.subf %235, %249 : vector<16x8xf32>
    %cst_82 = arith.constant 9.99999974E-6 : f32
    %251 = vector.broadcast %cst_82 : f32 to vector<16x1xf32>
    %252 = arith.addf %248, %251 : vector<16x1xf32>
    %253 = math.rsqrt %252 : vector<16x1xf32>
    %254 = vector.broadcast %253 : vector<16x1xf32> to vector<16x8xf32>
    %255 = arith.mulf %250, %254 : vector<16x8xf32>
    %256 = vector.broadcast %180 : vector<1x8xf32> to vector<16x8xf32>
    %257 = arith.mulf %255, %256 : vector<16x8xf32>
    %258 = vector.broadcast %182 : vector<1x8xf32> to vector<16x8xf32>
    %259 = arith.addf %257, %258 : vector<16x8xf32>
    %cst_83 = arith.constant 0.000000e+00 : f32
    %260 = vector.broadcast %cst_83 : f32 to vector<16x8xf32>
    %261 = arith.maximumf %259, %260 : vector<16x8xf32>
    %c0_84 = arith.constant 0 : index
    %c0_85 = arith.constant 0 : index
    %262 = vector.load %arg5[%c0_84, %c0_85] : memref<16x8xf32, #tpu.memory_space<vmem>>, vector<16x8xf32>
    tpu.vector_store %arg5[%c0_84, %c0_85], %261 {strides = array<i32>} : memref<16x8xf32, #tpu.memory_space<vmem>>, vector<16x8xf32>,
    return
  }
}

</mosaic_0001>

<bundles_post_ra>
// kernel: filter_forward.1
= control target key start
LH: loop header
LB: loop body
LE: loop exit
PB: predicated region body
PF: predicated region fallthrough
CT: control target
= control target key end

     0   :  { %vm50_vm0 = vcmask 1042432   ;;  %v1585_v0 = vmov 0.0|0.0   ;;  %vm1586_vm1 = vmmov 1   ;;  %vm1587_vm3 = vmmov 0   ;;  %s1589_s28 = smov 120   ;;  %s1592_s23 = smov 112   ;;  %s2007_s2 = inlined_call_operand.vmem [shape: f32[3,11,32], index: 2, kind: input, shape index: {}]   ;;  %s2008_s0 = inlined_call_operand.vmem [shape: f32[18,11], index: 0, kind: input, shape index: {}]   ;;  %s2009_s1 = inlined_call_operand.vmem [shape: f32[4,16,18], index: 1, kind: input, shape index: {}]   ;;  %s2010_s3 = inlined_call_operand.vmem [shape: f32[3,1,8], index: 3, kind: input, shape index: {}]   ;;  %s2011_s4 = inlined_call_operand.vmem [shape: f32[3,1,8], index: 4, kind: input, shape index: {}]   ;;  %s2012_s5 = inlined_call_operand.vmem [shape: f32[16,8], index: 5, kind: output, shape index: {}]  }
   0x1   :  { %1459 = vmatprep.subr.bf16.mxu0 %v1585_v0  ;;  %v36_v1 = vld [vmem:[%s2007_s2] sm:$0xff]  ;;  %v37_v2 = vld [vmem:[%s2007_s2 + $0x8] sm:$0x7]  ;;  %vm1631_vm2 = vmpackc.low %vm50_vm0, %vm1586_vm1  ;;  %v1588_v5 = vmov 0.0   ;;  %vm40_vm4 = vcmask 89088   ;;  %vm143_vm5 = vcmask 64512  }
   0x2   :  { %v1460_v4 = vpack.c.bf16 %v37_v2, %v36_v1  ;;  %1370 = vmatprep.mubr.msk.f32.mxu0 %vm1587_vm3, %v1588_v5  ;;  %v1642_v6 = vld [vmem:[%s2008_s0] sm:$0xff]  ;;  %v1651_v7 = vld [vmem:[%s2008_s0 + $0x8] sm:$0xff]  ;;  %v1660_v8 = vld [vmem:[%s2008_s0 + $0x10] sm:$0x3]  ;;  %v1590_v16 = vmov 16   ;;  %v1591_v23 = vmov 17  }
   0x3   :  { %1515 = vset.pattern.permute.xlu1 %v1590_v16  ;;  %vm1683_vm6 = vmpackc.low %vm143_vm5, %vm143_vm5  ;;  %1516 = vset.pattern.permute.xlu0 %v1591_v23  ;;  %v1285_v26 = vld [vmem:[%s2007_s2 + $0x10] sm:$0xff]  ;;  %v1286_v27 = vld [vmem:[%s2007_s2 + $0x18] sm:$0x7]  ;;  %vm259_vm7 = vcmask 146432   ;;  %vm332_vm8 = vcmask 1041408  }
   0x4   :  { %1462 = vmatpush3.bf16.msk.msra.mxu0 %vm1631_vm2, %v1460_v4  ;;  %v1474_v28 = vpack.c.bf16 %v1286_v27, %v1285_v26  ;;  %v1723_v30 = vld [vmem:[%s2009_s1 + $0x10] sm:$0xff]  ;;  %v1728_v31 = vld [vmem:[%s2009_s1 + $0x18] sm:$0xff]  ;;  %v1733_v32 = vld [vmem:[%s2009_s1 + $0x20] sm:$0xff] }
   0x5   :  { %v1741_v39 = vld [vmem:[%s2009_s1 + $0x28] sm:$0xff]  ;;  %v1747_v44 = vld [vmem:[%s2009_s1] sm:$0xff]  ;;  %v1761_v59 = vld [vmem:[%s2009_s1 + $0x30] sm:$0xff] }
   0x6   :  { %v1753_v48 = vld [vmem:[%s2009_s1 + $0x8] sm:$0xff]  ;;  %v1767_v62 = vld [vmem:[%s2009_s1 + $0x38] sm:$0xff] }
   0x7   :  { %1371 = vmatmul.mubr.msk.f32.vlgmr.msra.gmra.mrb[0].mxu0 %vm40_vm4, %v1642_v6 }
   0x8   :  { %1373 = vmatprep.mubr.msk.f32.mxu0 %vm1587_vm3, %v1588_v5 }
   0xb   :  { %1374 = vmatmul.mubr.msk.f32.gmra.mrb[2].mxu0 %vm40_vm4, %v1651_v7 }
   0xc   :  { %1376 = vmatprep.mubr.msk.f32.mxu0 %vm1587_vm3, %v1588_v5 }
   0xf   :  { %1377 = vmatmul.mubr.msk.f32.gmra.mrb[4].mxu0 %vm40_vm4, %v1660_v8 }
  0xda   :  { %v1664_v9 = vpop.f32.mrb[0].mxu0 }
  0xdb   :  { %v1372_v10 = vpop.f32.mrb[1].mxu0  ;;  %1385 = vmatprep.mubr.msk.f32.mxu1 %vm143_vm5, %v1664_v9 }
  0xde   :  { %v1668_v11 = vpop.f32.mrb[2].mxu0 }
  0xdf   :  { %v1375_v12 = vpop.f32.mrb[3].mxu0  ;;  %v1672_v13 = vpack.i.bf16 %v1668_v11, %v1664_v9 }
  0xe1   :  { %1511 = vrot.lane.b32.xlu0 %v1672_v13, %s1589_s28 }
  0xe2   :  { %v1676_v14 = vpop.f32.mrb[4].mxu0 }
  0xe3   :  { %v1378_v15 = vpop.f32.mrb[5].mxu0 }
  0xe5   :  { %141 = vrot.lane.b32.xlu0 %v1676_v14, %s1589_s28 }
 0x153   :  { %v1512_v17 = vpop.permute.xlu0 %1511 }
 0x154   :  { %v1514_v18 = vunpack.i.h.bf16 %v1512_v17  ;;  %v1513_v19 = vunpack.i.l.bf16 %v1512_v17 }
 0x156   :  { %v1463_v21 = vpack.c.bf16 %v1514_v18, %v1513_v19 }
 0x157   :  { %v142_v22 = vpop.permute.xlu0 %141 }
 0x158   :  { %1465 = vmatprep.subr.msk.bf16.mxu1 %vm1683_vm6, %v1463_v21 }
 0x159   :  { %1468 = vmatpush3.bf16.xpose.msk.msra.mxu1 %vm1683_vm6, %v1463_v21 }
 0x15a   :  { %1383 = vmatprep.subr.msk.mxu1 %vm143_vm5, %v142_v22 }
 0x161   :  { %1384 = vmatpush3.xpose.msk.msra.mxu1 %vm143_vm5, %v142_v22 }
 0x162   :  { %1473 = vmatprep.subr.bf16.mxu1 %v1585_v0 }
 0x164   :  { %1386 = vmatmul.mubr.msk.f32.vlgmr.msra.gmra.mrb[0].mxu1 %vm143_vm5, %v1668_v11 }
 0x165   :  { %1401 = vmatprep.mubr.msk.f32.mxu1 %vm1587_vm3, %v1588_v5  ;;  %1476 = vmatpush3.bf16.msk.msra.mxu1 %vm1631_vm2, %v1474_v28 }
 0x168   :  { %1402 = vmatmul.mubr.msk.f32.vlgmr.msra.gmra.mrb[2].mxu1 %vm40_vm4, %v1642_v6 }
 0x169   :  { %1404 = vmatprep.mubr.msk.f32.mxu1 %vm1587_vm3, %v1588_v5 }
 0x16c   :  { %1405 = vmatmul.mubr.msk.f32.gmra.mrb[4].mxu1 %vm40_vm4, %v1651_v7 }
 0x16d   :  { %1407 = vmatprep.mubr.msk.f32.mxu1 %vm1587_vm3, %v1588_v5 }
 0x170   :  { %1408 = vmatmul.mubr.msk.f32.gmra.mrb[6].mxu1 %vm40_vm4, %v1660_v8 }
 0x237   :  { %v1387_v24 = vpop.f32.mrb[0].mxu1 }
 0x238   :  { %236 = vperm.xlu1 %1515, %v1387_v24   ;;  %v220_v25 = vpop.f32.mrb[1].mxu1 }
 0x239   :  { %244 = vperm.xlu0 %1516, %v220_v25  }
 0x23b   :  { %v1776_v10 = vpop.f32.mrb[2].mxu1 }
 0x23c   :  { %231 = vperm.xlu1 %1515, %v220_v25   ;;  %v1403_v12 = vpop.f32.mrb[3].mxu1 }
 0x23d   :  { %1528 = vset.pattern.permute.xlu0 %v1590_v16 }
 0x23f   :  { %v1778_v15 = vpop.f32.mrb[4].mxu1 }
 0x240   :  { %1517 = vset.pattern.permute.xlu1 %v1591_v23  ;;  %v1782_v17 = vpack.i.bf16 %v1778_v15, %v1776_v10  ;;  %v1406_v18 = vpop.f32.mrb[5].mxu1 }
 0x241   :  { %248 = vperm.xlu1 %1517, %v1387_v24  }
 0x243   :  { %v1784_v19 = vpop.f32.mrb[6].mxu1 }
 0x244   :  { %v1409_v21 = vpop.f32.mrb[7].mxu1 }
 0x245   :  { %1529 = vset.pattern.permute.xlu1 %v1590_v16  ;;  %v1304_v21 = vld [vmem:[%s2007_s2 + $0x28] sm:$0x7] }
 0x2b7   :  { %v237_v29 = vpop.permute.xlu1 %236 }
 0x2b8   :  { %v245_v33 = vpop.permute.xlu0 %244  ;;  %v240_v36 = vmul.f32 %v1728_v31, %v237_v29 }
 0x2b9   :  { %v251_v37 = vmul.f32 %v1733_v32, %v245_v33 }
 0x2ba   :  { %v242_v42 = vadd.f32 %v1387_v24, %v240_v36 }
 0x2bb   :  { %v232_v34 = vpop.permute.xlu1 %231 }
 0x2bc   :  { %v239_v35 = vmul.f32 %v1723_v30, %v232_v34 }
 0x2be   :  { %v241_v38 = vadd.f32 %v239_v35, %v220_v25 }
 0x2c0   :  { %v253_v40 = vadd.f32 %v251_v37, %v241_v38  ;;  %v249_v41 = vpop.permute.xlu1 %248 }
 0x2c1   :  { %v252_v43 = vmul.f32 %v1741_v39, %v249_v41 }
 0x2c2   :  { %v255_v45 = vmul.f32 0.35355338, %v253_v40 }
 0x2c3   :  { %v254_v46 = vadd.f32 %v252_v43, %v242_v42 }
 0x2c4   :  { %v257_v47 = vadd.f32 %v255_v45, %v1747_v44 }
 0x2c5   :  { %v256_v49 = vmul.f32 0.35355338, %v254_v46 }
 0x2c6   :  { %v260_v50 = vsel %vm259_vm7, %v257_v47, -inf }
 0x2c7   :  { %261 = vmax.xlane.f32.xlu1 %v260_v50  ;;  %v258_v51 = vadd.f32 %v256_v49, %v1753_v48 }
 0x2c9   :  { %v263_v52 = vsel %vm259_vm7, %v258_v51, -inf }
 0x2ca   :  { %264 = vmax.xlane.f32.xlu0 %v263_v52 }
 0x354   :  { %v262_v53 = vpop.xlane.xlu1 %261 }
 0x355   :  { %v266_v54 = vsub.f32 %v257_v47, %v262_v53  ;;  %v34_v47 = vlaneseq }
 0x357   :  { %v268_v55 = vmul.f32 1.442695, %v266_v54  ;;  %v265_v56 = vpop.xlane.xlu0 %264  ;;  %v1800_v49 = vand.u32 127, %v34_v47 }
 0x358   :  { %v267_v57 = vsub.f32 %v258_v51, %v265_v56 }
 0x359   :  { %1549 = vpow2.f32 %v268_v55  ;;  %vm303_vm9 = vcmp.eq.s32.totalorder %v1800_v49, 17  ;;  %vm302_vm10 = vcmp.eq.s32.totalorder %v1800_v49, 16 }
 0x35a   :  { %v270_v58 = vmul.f32 1.442695, %v267_v57 }
 0x35c   :  { %1551 = vpow2.f32 %v270_v58 }
 0x363   :  { %v1550_v60 = vpop.eup %1549 }
 0x364   :  { %v272_v61 = vmul.f32 %v1550_v60, %v1761_v59 }
 0x366   :  { %v1552_v63 = vpop.eup %1551  ;;  %v274_v1 = vsel %vm259_vm7, %v272_v61, 0.0 }
 0x367   :  { %275 = vadd.xlane.f32.xlu0 %v274_v1  ;;  %v273_v2 = vmul.f32 %v1552_v63, %v1767_v62 }
 0x369   :  { %v277_v4 = vsel %vm259_vm7, %v273_v2, 0.0 }
 0x36a   :  { %278 = vadd.xlane.f32.xlu1 %v277_v4 }
 0x37b   :  { %316 = vrot.lane.b32.xlu1 %v1676_v14, %s1592_s23 }
 0x37d   :  { %1519 = vrot.lane.b32.xlu0 %v1672_v13, %s1592_s23 }
 0x3f4   :  { %v276_v22 = vpop.xlane.xlu0 %275 }
 0x3f5   :  { %v280_v24 = vmax.f32 %v276_v22, 1e-30 }
 0x3f7   :  { %v279_v25 = vpop.xlane.xlu1 %278  ;;  %1553 = vrcp.f32 %v280_v24 }
 0x3f8   :  { %v281_v14 = vmax.f32 %v279_v25, 1e-30  ;;  %v1520_v26 = vpop.permute.xlu0 %1519 }
 0x3f9   :  { %v1522_v13 = vunpack.i.h.bf16 %v1520_v26  ;;  %v1521_v27 = vunpack.i.l.bf16 %v1520_v26 }
 0x3fa   :  { %1555 = vrcp.f32 %v281_v14 }
 0x3fb   :  { %v1469_v28 = vpack.c.bf16 %v1522_v13, %v1521_v27  ;;  %v317_v29 = vpop.permute.xlu1 %316 }
 0x3fd   :  { %1470 = vmatprep.subr.bf16.mxu0 %v1469_v28 }
 0x3fe   :  { %1472 = vmatpush3.bf16.msra.mxu0 %v1469_v28 }
 0x3ff   :  { %1392 = vmatprep.subr.msk.mxu0 %vm332_vm8, %v317_v29 }
 0x401   :  { %v1554_v33 = vpop.eup %1553 }
 0x402   :  { %1393 = vmatpush3.msk.msra.mxu0 %vm332_vm8, %v317_v29  ;;  %v284_v36 = vmul.f32 %v1554_v33, %v272_v61 }
 0x404   :  { %v1556_v34 = vpop.eup %1555  ;;  %v294_v42 = vmul.f32 %v1733_v32, %v284_v36  ;;  %v286_v43 = vmul.f32 %v1723_v30, %v284_v36 }
 0x405   :  { %v285_v35 = vmul.f32 %v1556_v34, %v273_v2 }
 0x406   :  { %v296_v45 = vsel %vm259_vm7, %v294_v42, 0.0  ;;  %v288_v46 = vsel %vm259_vm7, %v286_v43, 0.0 }
 0x407   :  { %v295_v37 = vmul.f32 %v1741_v39, %v285_v35  ;;  %v287_v38 = vmul.f32 %v1728_v31, %v285_v35 }
 0x409   :  { %v299_v40 = vsel %vm259_vm7, %v295_v37, 0.0  ;;  %v291_v41 = vsel %vm259_vm7, %v287_v38, 0.0 }
 0x40a   :  { %300 = vadd.xlane.f32.xlu0 %v299_v40  ;;  %292 = vadd.xlane.f32.xlu1 %v291_v41 }
 0x40e   :  { %297 = vadd.xlane.f32.xlu0 %v296_v45  ;;  %289 = vadd.xlane.f32.xlu1 %v288_v46 }
 0x41f   :  { %1524 = vrot.lane.b32.xlu1 %v1782_v17, %s1589_s28 }
 0x424   :  { %552 = vrot.lane.b32.xlu0 %v1784_v19, %s1589_s28 }
 0x497   :  { %v301_v50 = vpop.xlane.xlu0 %300  ;;  %v293_v51 = vpop.xlane.xlu1 %292 }
 0x498   :  { %v307_v52 = vsel %vm303_vm9, %v301_v50, %v285_v35 }
 0x499   :  { %v311_v57 = vsel %vm302_vm10, %v293_v51, %v307_v52 }
 0x49b   :  { %v298_v53 = vpop.xlane.xlu0 %297  ;;  %v290_v54 = vpop.xlane.xlu1 %289 }
 0x49c   :  { %v306_v55 = vsel %vm303_vm9, %v298_v53, %v284_v36 }
 0x49d   :  { %v310_v56 = vsel %vm302_vm10, %v290_v54, %v306_v55 }
 0x49e   :  { %1394 = vmatprep.mubr.msk.f32.mxu0 %vm259_vm7, %v310_v56 }
 0x49f   :  { %1395 = vmatmul.mubr.msk.f32.vlgmr.msra.gmra.mrb[6].mxu0 %vm259_vm7, %v311_v57  ;;  %v1525_v58 = vpop.permute.xlu1 %1524  ;;  %v553_v1 = vpop.permute.xlu0 %552 }
 0x4a0   :  { %v1527_v60 = vunpack.i.h.bf16 %v1525_v58  ;;  %v1526_v61 = vunpack.i.l.bf16 %v1525_v58  ;;  %1416 = vmatprep.mubr.msk.f32.mxu0 %vm143_vm5, %v1776_v10 }
 0x4a2   :  { %v1477_v63 = vpack.c.bf16 %v1527_v60, %v1526_v61 }
 0x4a4   :  { %1479 = vmatprep.subr.msk.bf16.mxu0 %vm1683_vm6, %v1477_v63 }
 0x4a5   :  { %1482 = vmatpush3.bf16.xpose.msk.msra.mxu0 %vm1683_vm6, %v1477_v63 }
 0x4a6   :  { %1414 = vmatprep.subr.msk.mxu0 %vm143_vm5, %v553_v1 }
 0x4ad   :  { %1415 = vmatpush3.xpose.msk.msra.mxu0 %vm143_vm5, %v553_v1 }
 0x4ae   :  { %1487 = vmatprep.subr.bf16.mxu0 %v1585_v0  ;;  %v1303_v0 = vld [vmem:[%s2007_s2 + $0x20] sm:$0xff]  ;;  %s1593_s2 = smov 104  }
 0x4af   :  { %v1488_v22 = vpack.c.bf16 %v1304_v21, %v1303_v0 }
 0x4b0   :  { %1417 = vmatmul.mubr.msk.f32.vlgmr.msra.gmra.mrb[8].mxu0 %vm143_vm5, %v1778_v15 }
 0x4b1   :  { %1432 = vmatprep.mubr.msk.f32.mxu0 %vm1587_vm3, %v1588_v5  ;;  %1490 = vmatpush3.bf16.msk.msra.mxu0 %vm1631_vm2, %v1488_v22 }
 0x4b4   :  { %1433 = vmatmul.mubr.msk.f32.vlgmr.msra.gmra.mrb[10].mxu0 %vm40_vm4, %v1642_v6 }
 0x4b5   :  { %1435 = vmatprep.mubr.msk.f32.mxu0 %vm1587_vm3, %v1588_v5 }
 0x4b8   :  { %1436 = vmatmul.mubr.msk.f32.gmra.mrb[12].mxu0 %vm40_vm4, %v1651_v7 }
 0x4b9   :  { %1438 = vmatprep.mubr.msk.f32.mxu0 %vm1587_vm3, %v1588_v5 }
 0x4bc   :  { %1439 = vmatmul.mubr.msk.f32.gmra.mrb[14].mxu0 %vm40_vm4, %v1660_v8 }
 0x572   :  { %v1827_v2 = vpop.f32.mrb[6].mxu0 }
 0x573   :  { %v1829_v4 = vpop.f32.mrb[7].mxu0 }
 0x583   :  { %v1418_v12 = vpop.f32.mrb[8].mxu0 }
 0x584   :  { %646 = vperm.xlu0 %1528, %v1418_v12   ;;  %v630_v18 = vpop.f32.mrb[9].mxu0 }
 0x585   :  { %641 = vperm.xlu1 %1529, %v630_v18  }
 0x587   :  { %v1865_v56 = vpop.f32.mrb[10].mxu0 }
 0x588   :  { %v1434_v57 = vpop.f32.mrb[11].mxu0 }
 0x589   :  { %1530 = vset.pattern.permute.xlu1 %v1591_v23 }
 0x58a   :  { %654 = vperm.xlu1 %1530, %v630_v18  }
 0x58b   :  { %v1867_v58 = vpop.f32.mrb[12].mxu0 }
 0x58c   :  { %v1871_v60 = vpack.i.bf16 %v1867_v58, %v1865_v56  ;;  %v1437_v61 = vpop.f32.mrb[13].mxu0 }
 0x58e   :  { %658 = vperm.xlu1 %1530, %v1418_v12  }
 0x58f   :  { %v1873_v63 = vpop.f32.mrb[14].mxu0 }
 0x590   :  { %v1440_v1 = vpop.f32.mrb[15].mxu0 }
 0x592   :  { %1541 = vset.pattern.permute.xlu1 %v1590_v16 }
 0x603   :  { %v647_v3 = vpop.permute.xlu0 %646 }
 0x604   :  { %v642_v16 = vpop.permute.xlu1 %641  ;;  %v650_v14 = vmul.f32 %v1728_v31, %v647_v3 }
 0x605   :  { %v649_v24 = vmul.f32 %v1723_v30, %v642_v16 }
 0x606   :  { %v652_v28 = vadd.f32 %v1418_v12, %v650_v14 }
 0x607   :  { %v651_v6 = vadd.f32 %v649_v24, %v630_v18 }
 0x609   :  { %v655_v25 = vpop.permute.xlu1 %654 }
 0x60a   :  { %v661_v26 = vmul.f32 %v1733_v32, %v655_v25 }
 0x60c   :  { %v663_v13 = vadd.f32 %v661_v26, %v651_v6 }
 0x60d   :  { %v659_v27 = vpop.permute.xlu1 %658 }
 0x60e   :  { %v665_v7 = vmul.f32 0.35355338, %v663_v13  ;;  %v662_v29 = vmul.f32 %v1741_v39, %v659_v27 }
 0x610   :  { %v664_v5 = vadd.f32 %v662_v29, %v652_v28  ;;  %v667_v33 = vadd.f32 %v665_v7, %v1747_v44 }
 0x612   :  { %v666_v8 = vmul.f32 0.35355338, %v664_v5  ;;  %v669_v34 = vsel %vm259_vm7, %v667_v33, -inf }
 0x613   :  { %670 = vmax.xlane.f32.xlu0 %v669_v34 }
 0x614   :  { %v668_v35 = vadd.f32 %v666_v8, %v1753_v48 }
 0x616   :  { %v672_v36 = vsel %vm259_vm7, %v668_v35, -inf }
 0x617   :  { %673 = vmax.xlane.f32.xlu1 %v672_v36 }
 0x628   :  { %1532 = vrot.lane.b32.xlu1 %v1782_v17, %s1592_s23 }
 0x6a0   :  { %v671_v37 = vpop.xlane.xlu0 %670 }
 0x6a1   :  { %v675_v38 = vsub.f32 %v667_v33, %v671_v37 }
 0x6a3   :  { %v677_v40 = vmul.f32 1.442695, %v675_v38 }
 0x6a4   :  { %v674_v41 = vpop.xlane.xlu1 %673 }
 0x6a5   :  { %1557 = vpow2.f32 %v677_v40  ;;  %v676_v42 = vsub.f32 %v668_v35, %v674_v41 }
 0x6a7   :  { %v679_v43 = vmul.f32 1.442695, %v676_v42 }
 0x6a8   :  { %v1533_v45 = vpop.permute.xlu1 %1532 }
 0x6a9   :  { %1559 = vpow2.f32 %v679_v43  ;;  %v1535_v46 = vunpack.i.h.bf16 %v1533_v45  ;;  %v1534_v47 = vunpack.i.l.bf16 %v1533_v45 }
 0x6ab   :  { %v1483_v50 = vpack.c.bf16 %v1535_v46, %v1534_v47 }
 0x6ad   :  { %1484 = vmatprep.subr.bf16.mxu1 %v1483_v50 }
 0x6ae   :  { %1486 = vmatpush3.bf16.msra.mxu1 %v1483_v50 }
 0x6af   :  { %v1558_v51 = vpop.eup %1557 }
 0x6b0   :  { %v681_v52 = vmul.f32 %v1558_v51, %v1761_v59 }
 0x6b2   :  { %v683_v53 = vsel %vm259_vm7, %v681_v52, 0.0 }
 0x6b3   :  { %v1560_v17 = vpop.eup %1559  ;;  %684 = vadd.xlane.f32.xlu0 %v683_v53 }
 0x6b4   :  { %v682_v54 = vmul.f32 %v1560_v17, %v1767_v62 }
 0x6b6   :  { %v686_v55 = vsel %vm259_vm7, %v682_v54, 0.0 }
 0x6b7   :  { %687 = vadd.xlane.f32.xlu0 %v686_v55 }
 0x740   :  { %v685_v12 = vpop.xlane.xlu0 %684 }
 0x741   :  { %v689_v18 = vmax.f32 %v685_v12, 1e-30 }
 0x743   :  { %1561 = vrcp.f32 %v689_v18 }
 0x744   :  { %v688_v0 = vpop.xlane.xlu0 %687 }
 0x745   :  { %v690_v21 = vmax.f32 %v688_v0, 1e-30 }
 0x747   :  { %1563 = vrcp.f32 %v690_v21 }
 0x74d   :  { %v1562_v22 = vpop.eup %1561 }
 0x74e   :  { %v693_v3 = vmul.f32 %v1562_v22, %v681_v52 }
 0x750   :  { %v703_v13 = vmul.f32 %v1733_v32, %v693_v3  ;;  %v695_v27 = vmul.f32 %v1723_v30, %v693_v3 }
 0x751   :  { %v1564_v16 = vpop.eup %1563 }
 0x752   :  { %v694_v24 = vmul.f32 %v1564_v16, %v682_v54  ;;  %v705_v28 = vsel %vm259_vm7, %v703_v13, 0.0  ;;  %v697_v7 = vsel %vm259_vm7, %v695_v27, 0.0 }
 0x754   :  { %v704_v25 = vmul.f32 %v1741_v39, %v694_v24  ;;  %v696_v14 = vmul.f32 %v1728_v31, %v694_v24 }
 0x756   :  { %v708_v6 = vsel %vm259_vm7, %v704_v25, 0.0  ;;  %v700_v26 = vsel %vm259_vm7, %v696_v14, 0.0 }
 0x757   :  { %709 = vadd.xlane.f32.xlu1 %v708_v6  ;;  %701 = vadd.xlane.f32.xlu0 %v700_v26 }
 0x75b   :  { %706 = vadd.xlane.f32.xlu1 %v705_v28  ;;  %698 = vadd.xlane.f32.xlu0 %v697_v7 }
 0x76c   :  { %1537 = vrot.lane.b32.xlu1 %v1871_v60, %s1589_s28 }
 0x770   :  { %953 = vrot.lane.b32.xlu1 %v1873_v63, %s1589_s28 }
 0x771   :  { %719 = vrot.lane.b32.xlu0 %v1784_v19, %s1592_s23 }
 0x7e4   :  { %v702_v29 = vpop.xlane.xlu0 %701  ;;  %v710_v5 = vpop.xlane.xlu1 %709 }
 0x7e5   :  { %v712_v36 = vsel %vm303_vm9, %v710_v5, %v694_v24 }
 0x7e6   :  { %v714_v19 = vsel %vm302_vm10, %v702_v29, %v712_v36 }
 0x7e8   :  { %v699_v33 = vpop.xlane.xlu0 %698  ;;  %v707_v8 = vpop.xlane.xlu1 %706 }
 0x7e9   :  { %v711_v34 = vsel %vm303_vm9, %v707_v8, %v693_v3 }
 0x7ea   :  { %v713_v35 = vsel %vm302_vm10, %v699_v33, %v711_v34 }
 0x7eb   :  { %1425 = vmatprep.mubr.msk.f32.mxu1 %vm259_vm7, %v713_v35 }
 0x7ec   :  { %v720_v37 = vpop.permute.xlu0 %719  ;;  %v1538_v38 = vpop.permute.xlu1 %1537 }
 0x7ed   :  { %v1540_v40 = vunpack.i.h.bf16 %v1538_v38  ;;  %v1539_v41 = vunpack.i.l.bf16 %v1538_v38  ;;  %1423 = vmatprep.subr.msk.mxu1 %vm332_vm8, %v720_v37 }
 0x7ee   :  { %1424 = vmatpush3.msk.msra.mxu1 %vm332_vm8, %v720_v37 }
 0x7ef   :  { %v1491_v42 = vpack.c.bf16 %v1540_v40, %v1539_v41  ;;  %1426 = vmatmul.mubr.msk.f32.vlgmr.msra.gmra.mrb[8].mxu1 %vm259_vm7, %v714_v19 }
 0x7f0   :  { %1447 = vmatprep.mubr.msk.f32.mxu1 %vm143_vm5, %v1865_v56  ;;  %v954_v43 = vpop.permute.xlu1 %953 }
 0x7f1   :  { %1493 = vmatprep.subr.msk.bf16.mxu1 %vm1683_vm6, %v1491_v42 }
 0x7f5   :  { %1496 = vmatpush3.bf16.xpose.msk.msra.mxu1 %vm1683_vm6, %v1491_v42 }
 0x7f6   :  { %1445 = vmatprep.subr.msk.mxu1 %vm143_vm5, %v954_v43 }
 0x7fd   :  { %1446 = vmatpush3.xpose.msk.msra.mxu1 %vm143_vm5, %v954_v43 }
 0x800   :  { %1448 = vmatmul.mubr.msk.f32.vlgmr.msra.gmra.mrb[10].mxu1 %vm143_vm5, %v1867_v58 }
 0x8c2   :  { %v1911_v45 = vpop.f32.mrb[8].mxu1 }
 0x8c3   :  { %v1913_v46 = vpop.f32.mrb[9].mxu1 }
 0x8d3   :  { %v1449_v47 = vpop.f32.mrb[10].mxu1 }
 0x8d4   :  { %1047 = vperm.xlu1 %1541, %v1449_v47   ;;  %v1031_v50 = vpop.f32.mrb[11].mxu1 }
 0x8d5   :  { %1042 = vperm.xlu0 %1528, %v1031_v50  }
 0x8d8   :  { %1543 = vset.pattern.permute.xlu1 %v1591_v23 }
 0x8d9   :  { %1059 = vperm.xlu1 %1543, %v1449_v47   ;;  %1542 = vset.pattern.permute.xlu0 %v1591_v23 }
 0x8da   :  { %1055 = vperm.xlu0 %1542, %v1031_v50  }
 0x953   :  { %v1048_v20 = vpop.permute.xlu1 %1047 }
 0x954   :  { %v1043_v51 = vpop.permute.xlu0 %1042  ;;  %v1051_v52 = vmul.f32 %v1728_v31, %v1048_v20 }
 0x955   :  { %v1050_v53 = vmul.f32 %v1723_v30, %v1043_v51 }
 0x956   :  { %v1053_v54 = vadd.f32 %v1449_v47, %v1051_v52 }
 0x957   :  { %v1052_v61 = vadd.f32 %v1050_v53, %v1031_v50 }
 0x958   :  { %v1060_v17 = vpop.permute.xlu1 %1059 }
 0x959   :  { %v1063_v55 = vmul.f32 %v1741_v39, %v1060_v17  ;;  %v1056_v57 = vpop.permute.xlu0 %1055 }
 0x95a   :  { %v1062_v1 = vmul.f32 %v1733_v32, %v1056_v57 }
 0x95b   :  { %v1065_v12 = vadd.f32 %v1063_v55, %v1053_v54 }
 0x95c   :  { %v1064_v18 = vadd.f32 %v1062_v1, %v1052_v61 }
 0x95d   :  { %v1067_v0 = vmul.f32 0.35355338, %v1065_v12 }
 0x95e   :  { %v1066_v21 = vmul.f32 0.35355338, %v1064_v18 }
 0x95f   :  { %v1069_v23 = vadd.f32 %v1067_v0, %v1753_v48 }
 0x960   :  { %v1068_v22 = vadd.f32 %v1066_v21, %v1747_v44 }
 0x961   :  { %v1073_v16 = vsel %vm259_vm7, %v1069_v23, -inf }
 0x962   :  { %1074 = vmax.xlane.f32.xlu0 %v1073_v16  ;;  %v1070_v24 = vsel %vm259_vm7, %v1068_v22, -inf }
 0x963   :  { %1071 = vmax.xlane.f32.xlu1 %v1070_v24 }
 0x974   :  { %322 = vrot.lane.b32.xlu1 %v1668_v11, %s1593_s2 }
 0x978   :  { %320 = vrot.lane.b32.xlu0 %v1664_v9, %s1593_s2 }
 0x9ef   :  { %v1075_v3 = vpop.xlane.xlu0 %1074 }
 0x9f0   :  { %v1077_v25 = vsub.f32 %v1069_v23, %v1075_v3  ;;  %v1072_v14 = vpop.xlane.xlu1 %1071 }
 0x9f1   :  { %v1076_v6 = vsub.f32 %v1068_v22, %v1072_v14 }
 0x9f2   :  { %v1080_v48 = vmul.f32 1.442695, %v1077_v25 }
 0x9f3   :  { %v1078_v26 = vmul.f32 1.442695, %v1076_v6  ;;  %v321_v13 = vpop.permute.xlu0 %320 }
 0x9f4   :  { %1565 = vpow2.f32 %v1080_v48  ;;  %v323_v28 = vpop.permute.xlu1 %322  ;;  %v402_v11 = vadd.f32 %v1829_v4, %v321_v13 }
 0x9f5   :  { %1567 = vpow2.f32 %v1078_v26  ;;  %v407_v5 = vadd.f32 %v1827_v2, %v323_v28  ;;  %v1283_v26 = vld [vmem:[%s2010_s3] ss:$0 sm:$0xff] }
 0x9f6   :  { %v412_v8 = vsel %vm143_vm5, %v402_v11, 0.0 }
 0x9f7   :  { %v415_v34 = vsel %vm143_vm5, %v407_v5, 0.0 }
 0x9fe   :  { %v1566_v44 = vpop.eup %1565 }
 0x9ff   :  { %v1568_v27 = vpop.eup %1567  ;;  %v1083_v7 = vmul.f32 %v1566_v44, %v1767_v62 }
 0xa00   :  { %v1082_v29 = vmul.f32 %v1568_v27, %v1761_v59  ;;  %v1284_v27 = vld [vmem:[%s2011_s4] ss:$0 sm:$0xff] }
 0xa01   :  { %v1087_v9 = vsel %vm259_vm7, %v1083_v7, 0.0 }
 0xa02   :  { %1088 = vadd.xlane.f32.xlu0 %v1087_v9  ;;  %v1084_v33 = vsel %vm259_vm7, %v1082_v29, 0.0 }
 0xa03   :  { %1085 = vadd.xlane.f32.xlu1 %v1084_v33 }
 0xa06   :  { %413 = vadd.xlane.f32.xlu0 %v412_v8 }
 0xa07   :  { %416 = vadd.xlane.f32.xlu1 %v415_v34 }
 0xa8f   :  { %v1089_v35 = vpop.xlane.xlu0 %1088 }
 0xa90   :  { %v1091_v62 = vmax.f32 %v1089_v35, 1e-30  ;;  %v1086_v36 = vpop.xlane.xlu1 %1085 }
 0xa91   :  { %v1090_v59 = vmax.f32 %v1086_v36, 1e-30 }
 0xa92   :  { %1569 = vrcp.f32 %v1091_v62 }
 0xa93   :  { %1571 = vrcp.f32 %v1090_v59 }
 0xa9c   :  { %v1570_v4 = vpop.eup %1569 }
 0xa9d   :  { %v1572_v37 = vpop.eup %1571  ;;  %v1095_v38 = vmul.f32 %v1570_v4, %v1083_v7 }
 0xa9e   :  { %v1094_v2 = vmul.f32 %v1572_v37, %v1082_v29 }
 0xa9f   :  { %v1105_v40 = vmul.f32 %v1741_v39, %v1095_v38  ;;  %v1097_v41 = vmul.f32 %v1728_v31, %v1095_v38  ;;  %v414_v31 = vpop.xlane.xlu0 %413  ;;  %v417_v39 = vpop.xlane.xlu1 %416 }
 0xaa0   :  { %v1104_v43 = vmul.f32 %v1733_v32, %v1094_v2  ;;  %v1096_v47 = vmul.f32 %v1723_v30, %v1094_v2  ;;  %v419_v51 = vmul.f32 0.125, %v414_v31  ;;  %v420_v32 = vmul.f32 0.125, %v417_v39 }
 0xaa1   :  { %v1109_v19 = vsel %vm259_vm7, %v1105_v40, 0.0  ;;  %v1101_v42 = vsel %vm259_vm7, %v1097_v41, 0.0 }
 0xaa2   :  { %1110 = vadd.xlane.f32.xlu0 %v1109_v19  ;;  %1102 = vadd.xlane.f32.xlu1 %v1101_v42  ;;  %v1106_v50 = vsel %vm259_vm7, %v1104_v43, 0.0  ;;  %v1098_v20 = vsel %vm259_vm7, %v1096_v47, 0.0  ;;  %v421_v52 = vsub.f32 %v402_v11, %v419_v51  ;;  %v422_v30 = vsub.f32 %v407_v5, %v420_v32 }
 0xaa4   :  { %v424_v53 = vmul.f32 %v422_v30, %v422_v30  ;;  %v423_v17 = vmul.f32 %v421_v52, %v421_v52 }
 0xaa6   :  { %1107 = vadd.xlane.f32.xlu0 %v1106_v50  ;;  %1099 = vadd.xlane.f32.xlu1 %v1098_v20  ;;  %v428_v54 = vsel %vm143_vm5, %v424_v53, 0.0  ;;  %v425_v55 = vsel %vm143_vm5, %v423_v17, 0.0 }
 0xab7   :  { %1120 = vrot.lane.b32.xlu1 %v1873_v63, %s1592_s23 }
 0xabc   :  { %1545 = vrot.lane.b32.xlu0 %v1871_v60, %s1592_s23 }
 0xadb   :  { %429 = vadd.xlane.f32.xlu0 %v428_v54  ;;  %426 = vadd.xlane.f32.xlu1 %v425_v55 }
 0xaec   :  { %725 = vrot.lane.b32.xlu1 %v1778_v15, %s1593_s2 }
 0xaf1   :  { %723 = vrot.lane.b32.xlu0 %v1776_v10, %s1593_s2 }
 0xb2f   :  { %v1103_v60 = vpop.xlane.xlu1 %1102  ;;  %v1111_v63 = vpop.xlane.xlu0 %1110 }
 0xb30   :  { %v1113_v10 = vsel %vm303_vm9, %v1111_v63, %v1095_v38 }
 0xb31   :  { %v1115_v22 = vsel %vm302_vm10, %v1103_v60, %v1113_v10 }
 0xb33   :  { %v1100_v57 = vpop.xlane.xlu1 %1099  ;;  %v1108_v61 = vpop.xlane.xlu0 %1107 }
 0xb34   :  { %v1112_v1 = vsel %vm303_vm9, %v1108_v61, %v1094_v2 }
 0xb35   :  { %v1114_v12 = vsel %vm302_vm10, %v1100_v57, %v1112_v1 }
 0xb36   :  { %1456 = vmatprep.mubr.msk.f32.mxu0 %vm259_vm7, %v1114_v12 }
 0xb37   :  { %v1546_v18 = vpop.permute.xlu0 %1545  ;;  %v1121_v15 = vpop.permute.xlu1 %1120 }
 0xb38   :  { %v1548_v0 = vunpack.i.h.bf16 %v1546_v18  ;;  %v1547_v21 = vunpack.i.l.bf16 %v1546_v18 }
 0xb3a   :  { %v1497_v23 = vpack.c.bf16 %v1548_v0, %v1547_v21 }
 0xb3c   :  { %1498 = vmatprep.subr.bf16.mxu0 %v1497_v23 }
 0xb3d   :  { %1500 = vmatpush3.bf16.msra.mxu0 %v1497_v23 }
 0xb3e   :  { %1454 = vmatprep.subr.msk.mxu0 %vm332_vm8, %v1121_v15 }
 0xb41   :  { %1455 = vmatpush3.msk.msra.mxu0 %vm332_vm8, %v1121_v15 }
 0xb42   :  { %1457 = vmatmul.mubr.msk.f32.vlgmr.msra.gmra.mrb[16].mxu0 %vm259_vm7, %v1115_v22 }
 0xb68   :  { %v427_v16 = vpop.xlane.xlu1 %426  ;;  %v430_v24 = vpop.xlane.xlu0 %429 }
 0xb69   :  { %v431_v3 = vmul.f32 0.125, %v427_v16  ;;  %v432_v25 = vmul.f32 0.125, %v430_v24 }
 0xb6b   :  { %v433_v14 = vadd.f32 1e-05, %v431_v3  ;;  %v434_v6 = vadd.f32 1e-05, %v432_v25 }
 0xb6c   :  { %v724_v13 = vpop.permute.xlu0 %723  ;;  %v726_v7 = vpop.permute.xlu1 %725 }
 0xb6d   :  { %1573 = vrsqrt.f32 %v433_v14  ;;  %v804_v9 = vadd.f32 %v1913_v46, %v724_v13  ;;  %v809_v33 = vadd.f32 %v1911_v45, %v726_v7  ;;  %v1319_v7 = vld [vmem:[%s2010_s3 + $0x2] ss:$0 sm:$0xff] }
 0xb6e   :  { %1575 = vrsqrt.f32 %v434_v6 }
 0xb77   :  { %v1574_v48 = vpop.eup %1573 }
 0xb78   :  { %v1576_v44 = vpop.eup %1575  ;;  %v437_v49 = vmul.f32 %v1574_v48, %v421_v52  ;;  %v1301_v52 = vld [vmem:[%s2010_s3 + $0x1] ss:$0 sm:$0xff] }
 0xb79   :  { %v438_v28 = vmul.f32 %v1576_v44, %v422_v30 }
 0xb7a   :  { %v445_v29 = vmul.f32 %v1283_v26, %v437_v49 }
 0xb7b   :  { %v446_v11 = vmul.f32 %v1283_v26, %v438_v28 }
 0xb7c   :  { %v453_v5 = vadd.f32 %v1284_v27, %v445_v29 }
 0xb7d   :  { %v454_v8 = vadd.f32 %v1284_v27, %v446_v11 }
 0xb7e   :  { %v812_v34 = vadd.f32 %v804_v9, %v453_v5  ;;  %v1320_v9 = vld [vmem:[%s2011_s4 + $0x2] ss:$0 sm:$0xff] }
 0xb7f   :  { %v813_v35 = vadd.f32 %v809_v33, %v454_v8 }
 0xb80   :  { %v814_v62 = vsel %vm143_vm5, %v812_v34, 0.0 }
 0xb81   :  { %v817_v36 = vsel %vm143_vm5, %v813_v35, 0.0  ;;  %815 = vadd.xlane.f32.xlu1 %v814_v62 }
 0xb82   :  { %818 = vadd.xlane.f32.xlu0 %v817_v36 }
 0xc0e   :  { %v816_v59 = vpop.xlane.xlu1 %815 }
 0xc0f   :  { %v820_v4 = vmul.f32 0.125, %v816_v59  ;;  %v819_v37 = vpop.xlane.xlu0 %818 }
 0xc10   :  { %v821_v38 = vmul.f32 0.125, %v819_v37 }
 0xc11   :  { %v822_v2 = vsub.f32 %v812_v34, %v820_v4 }
 0xc12   :  { %v823_v40 = vsub.f32 %v813_v35, %v821_v38 }
 0xc13   :  { %v824_v41 = vmul.f32 %v822_v2, %v822_v2 }
 0xc14   :  { %v825_v46 = vmul.f32 %v823_v40, %v823_v40 }
 0xc15   :  { %v1458_v19 = vpop.f32.mrb[16].mxu0  ;;  %v826_v45 = vsel %vm143_vm5, %v824_v41, 0.0 }
 0xc16   :  { %827 = vadd.xlane.f32.xlu0 %v826_v45  ;;  %v829_v42 = vsel %vm143_vm5, %v825_v46, 0.0  ;;  %v1204_v43 = vpop.f32.mrb[17].mxu0 }
 0xc17   :  { %830 = vadd.xlane.f32.xlu1 %v829_v42 }
 0xc28   :  { %1126 = vrot.lane.b32.xlu1 %v1867_v58, %s1593_s2 }
 0xc2c   :  { %1124 = vrot.lane.b32.xlu0 %v1865_v56, %s1593_s2  ;;  %v1302_v56 = vld [vmem:[%s2011_s4 + $0x1] ss:$0 sm:$0xff] }
 0xca3   :  { %v828_v47 = vpop.xlane.xlu0 %827 }
 0xca4   :  { %v831_v50 = vpop.xlane.xlu1 %830  ;;  %v832_v20 = vmul.f32 0.125, %v828_v47 }
 0xca5   :  { %v833_v31 = vmul.f32 0.125, %v831_v50 }
 0xca6   :  { %v834_v39 = vadd.f32 1e-05, %v832_v20 }
 0xca7   :  { %v835_v51 = vadd.f32 1e-05, %v833_v31  ;;  %v1125_v17 = vpop.permute.xlu0 %1124 }
 0xca8   :  { %1577 = vrsqrt.f32 %v834_v39  ;;  %v1127_v54 = vpop.permute.xlu1 %1126  ;;  %v1205_v63 = vadd.f32 %v1204_v43, %v1125_v17 }
 0xca9   :  { %1579 = vrsqrt.f32 %v835_v51  ;;  %v1210_v61 = vadd.f32 %v1458_v19, %v1127_v54 }
 0xcb2   :  { %v1578_v32 = vpop.eup %1577 }
 0xcb3   :  { %v1580_v30 = vpop.eup %1579  ;;  %v838_v53 = vmul.f32 %v1578_v32, %v822_v2 }
 0xcb4   :  { %v839_v58 = vmul.f32 %v1580_v30, %v823_v40 }
 0xcb5   :  { %v846_v55 = vmul.f32 %v1301_v52, %v838_v53 }
 0xcb6   :  { %v847_v60 = vmul.f32 %v1301_v52, %v839_v58 }
 0xcb7   :  { %v854_v57 = vadd.f32 %v1302_v56, %v846_v55 }
 0xcb8   :  { %v855_v1 = vadd.f32 %v1302_v56, %v847_v60 }
 0xcb9   :  { %v1213_v12 = vadd.f32 %v1205_v63, %v854_v57 }
 0xcba   :  { %v1214_v18 = vadd.f32 %v1210_v61, %v855_v1 }
 0xcbb   :  { %v1215_v0 = vsel %vm143_vm5, %v1213_v12, 0.0 }
 0xcbc   :  { %v1218_v21 = vsel %vm143_vm5, %v1214_v18, 0.0  ;;  %1216 = vadd.xlane.f32.xlu1 %v1215_v0 }
 0xcbd   :  { %1219 = vadd.xlane.f32.xlu0 %v1218_v21 }
 0xd49   :  { %v1217_v23 = vpop.xlane.xlu1 %1216 }
 0xd4a   :  { %v1220_v15 = vpop.xlane.xlu0 %1219  ;;  %v1221_v10 = vmul.f32 0.125, %v1217_v23 }
 0xd4b   :  { %v1222_v22 = vmul.f32 0.125, %v1220_v15 }
 0xd4c   :  { %v1223_v16 = vsub.f32 %v1213_v12, %v1221_v10 }
 0xd4d   :  { %v1224_v24 = vsub.f32 %v1214_v18, %v1222_v22 }
 0xd4e   :  { %v1225_v3 = vmul.f32 %v1223_v16, %v1223_v16 }
 0xd4f   :  { %v1226_v25 = vmul.f32 %v1224_v24, %v1224_v24 }
 0xd50   :  { %v1227_v14 = vsel %vm143_vm5, %v1225_v3, 0.0 }
 0xd51   :  { %v1230_v6 = vsel %vm143_vm5, %v1226_v25, 0.0  ;;  %1228 = vadd.xlane.f32.xlu0 %v1227_v14 }
 0xd52   :  { %1231 = vadd.xlane.f32.xlu1 %v1230_v6 }
 0xdde   :  { %v1229_v48 = vpop.xlane.xlu0 %1228 }
 0xddf   :  { %v1233_v26 = vmul.f32 0.125, %v1229_v48  ;;  %v1232_v44 = vpop.xlane.xlu1 %1231 }
 0xde0   :  { %v1234_v49 = vmul.f32 0.125, %v1232_v44 }
 0xde1   :  { %v1235_v13 = vadd.f32 1e-05, %v1233_v26 }
 0xde2   :  { %v1236_v27 = vadd.f32 1e-05, %v1234_v49 }
 0xde3   :  { %1581 = vrsqrt.f32 %v1235_v13 }
 0xde4   :  { %1583 = vrsqrt.f32 %v1236_v27 }
 0xded   :  { %v1582_v28 = vpop.eup %1581 }
 0xdee   :  { %v1584_v29 = vpop.eup %1583  ;;  %v1239_v11 = vmul.f32 %v1582_v28, %v1223_v16 }
 0xdef   :  { %v1240_v5 = vmul.f32 %v1584_v29, %v1224_v24 }
 0xdf0   :  { %v1247_v33 = vmul.f32 %v1319_v7, %v1239_v11 }
 0xdf1   :  { %v1248_v8 = vmul.f32 %v1319_v7, %v1240_v5 }
 0xdf2   :  { %v1255_v34 = vadd.f32 %v1320_v9, %v1247_v33 }
 0xdf3   :  { %v1256_v35 = vadd.f32 %v1320_v9, %v1248_v8 }
 0xdf4   :  { %v1257_v62 = vmax.f32 %v1255_v34, 0.0 }
 0xdf5   :  { %v1258_v36 = vmax.f32 %v1256_v35, 0.0 }
 0xdf6   :  { %1259 = vst.msk [vmem:[%s2012_s5] sm:$0xff] %vm143_vm5, %v1257_v62 }
 0xdf7   :  { %1260 = vst.msk [vmem:[%s2012_s5 + $0x8] sm:$0xff] %vm143_vm5, %v1258_v36 }

</bundles_post_ra>
